<compile_context>
chip_gen: v5e
topology: v5e:2x2
jax: 0.10.0
libtpu: 0.0.40
codegen_flags: <defaults>
</compile_context>

<pallas_src>
import functools

import jax
import jax.numpy as jnp
from jax import lax
from jax.experimental import pallas as pl
from jax.experimental.pallas import tpu as pltpu


def _round_up(x: int, m: int) -> int:
    return (x + m - 1) // m * m


def _linear_kernel(x_ref, w_ref, b_ref, o_ref, *, compute_dtype):
    # Single K tile: contract the whole in_features dim, fused bias add.
    # x_ref: (TM, K)  activations
    # w_ref: (TN, K)  weight tile, PyTorch (out_features, in_features) layout
    # b_ref: (1, TN)  bias slice for this N tile
    # o_ref: (TM, TN)
    x = x_ref[...].astype(compute_dtype)
    w = w_ref[...].astype(compute_dtype)
    acc = lax.dot_general(
        x, w,
        dimension_numbers=(((1,), (1,)), ((), ())),  # contract over in_features
        preferred_element_type=jnp.float32,
    )
    o_ref[...] = (acc + b_ref[...].astype(jnp.float32)).astype(o_ref.dtype)


def _linear_kernel_ksplit(x_ref, w_ref, b_ref, o_ref, acc_ref, *, compute_dtype):
    # K-tiled variant: f32 accumulator in VMEM, init at k==0, bias+store at last k.
    k = pl.program_id(2)

    @pl.when(k == 0)
    def _():
        acc_ref[...] = jnp.zeros_like(acc_ref)

    x = x_ref[...].astype(compute_dtype)
    w = w_ref[...].astype(compute_dtype)
    acc_ref[...] += lax.dot_general(
        x, w,
        dimension_numbers=(((1,), (1,)), ((), ())),
        preferred_element_type=jnp.float32,
    )

    @pl.when(k == pl.num_programs(2) - 1)
    def _():
        o_ref[...] = (acc_ref[...] + b_ref[...].astype(jnp.float32)).astype(o_ref.dtype)


def dummy_sublayer(x, weight, bias, *, tm=256, tn=256, tk=1024,
                   use_bf16_operands=False):
    """y = x @ weight.T + bias, matching torch.nn.Linear.

    x:      (batch, seq, d_model)
    weight: (d_model, d_model)   PyTorch (out, in) convention (NOT transposed here)
    bias:   (d_model,)
    """
    B, S, D = x.shape
    M = B * S
    N = D  # out_features == in_features == d_model
    K = D

    # Lane/sublane-friendly padded extents. Zero padding on K contributes 0 to
    # the dot product; padded M rows / N cols are sliced off below.
    if _round_up(K, 128) <= tk:
        Kp = _round_up(K, 128)
        TK = Kp                       # single K tile -> no accumulator needed
    else:
        TK = tk                       # split K; tk is a multiple of 128
        Kp = _round_up(K, TK)
    TM = min(tm, _round_up(M, 8))
    TN = min(tn, _round_up(N, 128))
    Mp = _round_up(M, TM)
    Np = _round_up(N, TN)
    nk = Kp // TK

    x2d = x.reshape(M, K)
    if (Mp, Kp) != (M, K):
        x2d = jnp.pad(x2d, ((0, Mp - M), (0, Kp - K)))
    w_p = weight if (Np, Kp) == (N, K) else jnp.pad(weight, ((0, Np - N), (0, Kp - K)))
    b_p = (bias if Np == N else jnp.pad(bias, (0, Np - N))).reshape(1, Np)

    # Double-buffered VMEM budget (f32): x, w, bias, out tiles (+ acc scratch).
    tile_bytes = (2 * (TM * TK + TN * TK + TN + TM * TN) + TM * TN) * 4
    vmem_limit = min(128 * 1024 * 1024,
                     max(16 * 1024 * 1024, tile_bytes + (4 << 20)))

    cost = pl.CostEstimate(
        flops=2 * Mp * Np * Kp,
        transcendentals=0,
        bytes_accessed=(Mp * Kp + Np * Kp + Np + Mp * Np) * 4,
    )

    compute_dtype = jnp.bfloat16 if use_bf16_operands else x.dtype

    if nk == 1:
        kernel = functools.partial(_linear_kernel, compute_dtype=compute_dtype)
        grid = (Mp // TM, Np // TN)
        in_specs = [
            pl.BlockSpec((TM, Kp), lambda i, j: (i, 0)),   # activations
            pl.BlockSpec((TN, Kp), lambda i, j: (j, 0)),   # weight (out, in)
            pl.BlockSpec((1, TN), lambda i, j: (0, j)),    # bias slice
        ]
        out_specs = pl.BlockSpec((TM, TN), lambda i, j: (i, j))
        scratch_shapes = []
        dim_sem = ("parallel", "parallel")
    else:
        kernel = functools.partial(_linear_kernel_ksplit, compute_dtype=compute_dtype)
        grid = (Mp // TM, Np // TN, nk)                    # reduction axis last
        in_specs = [
            pl.BlockSpec((TM, TK), lambda i, j, k: (i, k)),
            pl.BlockSpec((TN, TK), lambda i, j, k: (j, k)),
            pl.BlockSpec((1, TN), lambda i, j, k: (0, j)),
        ]
        out_specs = pl.BlockSpec((TM, TN), lambda i, j, k: (i, j))
        scratch_shapes = [pltpu.VMEM((TM, TN), jnp.float32)]
        dim_sem = ("parallel", "parallel", "arbitrary")

    out2d = pl.pallas_call(
        kernel,
        out_shape=jax.ShapeDtypeStruct((Mp, Np), x.dtype),
        grid_spec=pltpu.PrefetchScalarGridSpec(
            num_scalar_prefetch=0,
            grid=grid,
            in_specs=in_specs,
            out_specs=out_specs,
            scratch_shapes=scratch_shapes,
        ),
        compiler_params=pltpu.CompilerParams(
            dimension_semantics=dim_sem,
            vmem_limit_bytes=vmem_limit,
        ),
        cost_estimate=cost,
    )(x2d, w_p, b_p)

    out = out2d if (Mp, Np) == (M, N) else out2d[:M, :N]
    return out.reshape(B, S, D)


if __name__ == "__main__":
    d_model = 32
    batch, seq = 2, 8

    key = jax.random.PRNGKey(0)
    kx, kw, kb = jax.random.split(key, 3)

    # Deterministic parameter init (shapes match nn.Linear(d_model, d_model)).
    bound = 1.0 / (d_model ** 0.5)
    weight = jax.random.uniform(kw, (d_model, d_model),
                                minval=-bound, maxval=bound, dtype=jnp.float32)
    bias = jax.random.uniform(kb, (d_model,),
                              minval=-bound, maxval=bound, dtype=jnp.float32)

    x = jax.random.normal(kx, (batch, seq, d_model), dtype=jnp.float32)

    # jit the wrapper so the pad / slice / reshape plumbing fuses around the
    # pallas_call instead of dispatching as separate XLA ops.
    fwd = jax.jit(dummy_sublayer)
    y = fwd(x, weight, bias)
    jax.block_until_ready(y)

    # Sanity check against plain-JAX reference (f32 path -> tight tolerance).
    y_ref = x @ weight.T + bias
    assert y.shape == (batch, seq, d_model)
    assert jnp.allclose(y, y_ref, atol=1e-5, rtol=1e-5)

    print("KERNEL_OK")
</pallas_src>

<mosaic_0001>
module attributes {stable_mosaic.version = 11 : i64} {
  func.func @_linear_kernel(%arg0: i32, %arg1: i32, %arg2: memref<16x128xf32, #tpu.memory_space<vmem>>, %arg3: memref<128x128xf32, #tpu.memory_space<vmem>>, %arg4: memref<1x128xf32, #tpu.memory_space<vmem>>, %arg5: memref<16x128xf32, #tpu.memory_space<vmem>>) attributes {dimension_semantics = [#tpu.dimension_semantics<parallel>, #tpu.dimension_semantics<parallel>], iteration_bounds = array<i64: 1, 1>, scalar_prefetch = 0 : i64, scratch_operands = 0 : i64, tpu.core_type = #tpu.core_type<tc>, window_params = [{transform_indices = @transform_0, window_bounds = array<i64: 16, 128>}, {transform_indices = @transform_1, window_bounds = array<i64: 128, 128>}, {transform_indices = @transform_2, window_bounds = array<i64: 1, 128>}, {transform_indices = @transform_3, window_bounds = array<i64: 16, 128>}]} {
    %c0 = arith.constant 0 : index
    %c0_0 = arith.constant 0 : index
    %0 = vector.load %arg2[%c0, %c0_0] : memref<16x128xf32, #tpu.memory_space<vmem>>, vector<16x128xf32>
    %c0_1 = arith.constant 0 : index
    %c0_2 = arith.constant 0 : index
    %1 = vector.load %arg3[%c0_1, %c0_2] : memref<128x128xf32, #tpu.memory_space<vmem>>, vector<128x128xf32>
    %cst = arith.constant dense<0.000000e+00> : vector<16x128xf32>
    %2 = tpu.matmul %0, %1, %cst {dimension_numbers = #tpu.dot_dimension_numbers<[1], [1], [0], [0], [0, 0, 1, 0], [], []>} : vector<16x128xf32>, vector<128x128xf32>, vector<16x128xf32> -> vector<16x128xf32>
    %c0_3 = arith.constant 0 : index
    %c0_4 = arith.constant 0 : index
    %3 = vector.load %arg4[%c0_3, %c0_4] : memref<1x128xf32, #tpu.memory_space<vmem>>, vector<1x128xf32>
    %4 = vector.broadcast %3 : vector<1x128xf32> to vector<16x128xf32>
    %5 = arith.addf %2, %4 : vector<16x128xf32>
    %c0_5 = arith.constant 0 : index
    %c0_6 = arith.constant 0 : index
    %6 = vector.load %arg5[%c0_5, %c0_6] : memref<16x128xf32, #tpu.memory_space<vmem>>, vector<16x128xf32>
    tpu.vector_store %arg5[%c0_5, %c0_6], %5 {strides = array<i32>} : memref<16x128xf32, #tpu.memory_space<vmem>>, vector<16x128xf32>,
    return
  }
  func.func @transform_0(%arg0: i32, %arg1: i32) -> (i32, i32) {
    %c0_i32 = arith.constant 0 : i32
    %c0_i32_0 = arith.constant 0 : i32
    return %arg0, %c0_i32 : i32, i32
  }
  func.func @transform_1(%arg0: i32, %arg1: i32) -> (i32, i32) {
    %c0_i32 = arith.constant 0 : i32
    %c0_i32_0 = arith.constant 0 : i32
    return %arg1, %c0_i32 : i32, i32
  }
  func.func @transform_2(%arg0: i32, %arg1: i32) -> (i32, i32) {
    %c0_i32 = arith.constant 0 : i32
    %c0_i32_0 = arith.constant 0 : i32
    return %c0_i32, %arg1 : i32, i32
  }
  func.func @transform_3(%arg0: i32, %arg1: i32) -> (i32, i32) {
    %c0_i32 = arith.constant 0 : i32
    return %arg0, %arg1 : i32, i32
  }
}

</mosaic_0001>

<bundles_post_ra>
// kernel: dummy_sublayer.1
= control target key start
LH: loop header
LB: loop body
LE: loop exit
PB: predicated region body
PF: predicated region fallthrough
CT: control target
= control target key end

     0   :  { %s165_s1 = inlined_call_operand.vmem [shape: f32[128,128], index: 1, kind: input, shape index: {}]   ;;  %s166_s2 = inlined_call_operand.vmem [shape: f32[1,128], index: 2, kind: input, shape index: {}]   ;;  %s167_s0 = inlined_call_operand.vmem [shape: f32[16,128], index: 0, kind: input, shape index: {}]   ;;  %s168_s3 = inlined_call_operand.vmem [shape: f32[16,128], index: 3, kind: output, shape index: {}]  }
   0x1   :  { %v31_v0 = vld [vmem:[%s165_s1 + $0x78] sm:$0xff]  ;;  %v30_v1 = vld [vmem:[%s165_s1 + $0x70] sm:$0xff]  ;;  %v29_v2 = vld [vmem:[%s165_s1 + $0x68] sm:$0xff] }
   0x2   :  { %36 = vmatpush.xpose.msra.mxu0 %v31_v0  ;;  %65 = vmatpush.xpose.msra.mxu1 %v31_v0  ;;  %v28_v3 = vld [vmem:[%s165_s1 + $0x60] sm:$0xff]  ;;  %v27_v4 = vld [vmem:[%s165_s1 + $0x58] sm:$0xff]  ;;  %v26_v5 = vld [vmem:[%s165_s1 + $0x50] sm:$0xff] }
   0x3   :  { %v25_v6 = vld [vmem:[%s165_s1 + $0x48] sm:$0xff]  ;;  %v24_v7 = vld [vmem:[%s165_s1 + $0x40] sm:$0xff]  ;;  %v23_v8 = vld [vmem:[%s165_s1 + $0x38] sm:$0xff] }
   0x4   :  { %v22_v9 = vld [vmem:[%s165_s1 + $0x30] sm:$0xff]  ;;  %v21_v10 = vld [vmem:[%s165_s1 + $0x28] sm:$0xff]  ;;  %v20_v11 = vld [vmem:[%s165_s1 + $0x20] sm:$0xff] }
   0x5   :  { %v19_v12 = vld [vmem:[%s165_s1 + $0x18] sm:$0xff]  ;;  %v18_v13 = vld [vmem:[%s165_s1 + $0x10] sm:$0xff]  ;;  %v17_v14 = vld [vmem:[%s165_s1 + $0x8] sm:$0xff] }
   0x6   :  { %37 = vmatpush.xpose.msra.mxu0 %v30_v1  ;;  %66 = vmatpush.xpose.msra.mxu1 %v30_v1  ;;  %v16_v15 = vld [vmem:[%s165_s1] sm:$0xff]  ;;  %v15_v17 = vld [vmem:[%s167_s0 + $0x8] sm:$0xff] }
   0x7   :  { %v14_v16 = vld [vmem:[%s167_s0] sm:$0xff] }
   0x8   :  { %v81_v18 = vld [vmem:[%s166_s2] ss:$0 sm:$0xff] }
   0xa   :  { %38 = vmatpush.xpose.msra.mxu0 %v29_v2  ;;  %67 = vmatpush.xpose.msra.mxu1 %v29_v2 }
   0xe   :  { %39 = vmatpush.xpose.msra.mxu0 %v28_v3  ;;  %68 = vmatpush.xpose.msra.mxu1 %v28_v3 }
  0x12   :  { %40 = vmatpush.xpose.msra.mxu0 %v27_v4  ;;  %69 = vmatpush.xpose.msra.mxu1 %v27_v4 }
  0x16   :  { %41 = vmatpush.xpose.msra.mxu0 %v26_v5  ;;  %70 = vmatpush.xpose.msra.mxu1 %v26_v5 }
  0x1a   :  { %42 = vmatpush.xpose.msra.mxu0 %v25_v6  ;;  %71 = vmatpush.xpose.msra.mxu1 %v25_v6 }
  0x1e   :  { %43 = vmatpush.xpose.msra.mxu0 %v24_v7  ;;  %72 = vmatpush.xpose.msra.mxu1 %v24_v7 }
  0x22   :  { %44 = vmatpush.xpose.msra.mxu0 %v23_v8  ;;  %73 = vmatpush.xpose.msra.mxu1 %v23_v8 }
  0x26   :  { %45 = vmatpush.xpose.msra.mxu0 %v22_v9  ;;  %74 = vmatpush.xpose.msra.mxu1 %v22_v9 }
  0x2a   :  { %46 = vmatpush.xpose.msra.mxu0 %v21_v10  ;;  %75 = vmatpush.xpose.msra.mxu1 %v21_v10 }
  0x2e   :  { %47 = vmatpush.xpose.msra.mxu0 %v20_v11  ;;  %76 = vmatpush.xpose.msra.mxu1 %v20_v11 }
  0x32   :  { %48 = vmatpush.xpose.msra.mxu0 %v19_v12  ;;  %77 = vmatpush.xpose.msra.mxu1 %v19_v12 }
  0x36   :  { %49 = vmatpush.xpose.msra.mxu0 %v18_v13  ;;  %78 = vmatpush.xpose.msra.mxu1 %v18_v13 }
  0x3a   :  { %50 = vmatpush.xpose.msra.mxu0 %v17_v14  ;;  %79 = vmatpush.xpose.msra.mxu1 %v17_v14 }
  0x3e   :  { %51 = vmatpush.xpose.msra.mxu0 %v16_v15  ;;  %80 = vmatpush.xpose.msra.mxu1 %v16_v15 }
  0x41   :  { %52 = vmatmul.f32.vlgmr.msra.gmra.mxu0 %v14_v16  ;;  %55 = vmatmul.f32.vlgmr.msra.gmra.mxu1 %v15_v17 }
  0xbe   :  { %v53_v19 = vpop.f32.mrf.mxu0  ;;  %v56_v20 = vpop.f32.mrf.mxu1 }
  0xbf   :  { %v54_v21 = vadd.f32 %v81_v18, %v53_v19  ;;  %v57_v22 = vadd.f32 %v81_v18, %v56_v20 }
  0xc1   :  { %59 = vst [vmem:[%s168_s3] sm:$0xff] %v54_v21 }
  0xc2   :  { %60 = vst [vmem:[%s168_s3 + $0x8] sm:$0xff] %v57_v22 }

</bundles_post_ra>
